<compile_context>
chip_gen: v5e
topology: v5e:2x2
jax: 0.10.0
libtpu: 0.0.40
codegen_flags: <defaults>
</compile_context>

<pallas_src>
import functools

import jax
import jax.numpy as jnp
from jax.experimental import pallas as pl
from jax.experimental.pallas import tpu as pltpu

ATT_DIM = 256          # attention.att_dim (fixed at 256 in the PyTorch module)
PATCH = 32             # stand-in Conv1d kernel_size == stride


class Config:
    epoch_len = 7
    tc_hidden_dim = 128


# --------------------------- fused Pallas kernel ------------------------------

def _fused_forward_kernel(patches_ref, conv_w_ref, conv_b_ref,
                          att_w_ref, att_v_ref,
                          pw1_ref, pb1_ref, pw2cat_ref, pb2cat_ref,
                          qw2_ref, qb2_ref,
                          out_ref,
                          *, n_seq, seq_len, hidden):
    bf16 = jnp.bfloat16

    # ---- BaseNet stand-in: Conv1d(1, 256, k=32, s=32) + ReLU as one patches matmul
    # TODO(synk): BaseNet (time_model) source is not in the provided module; this is a stand-in.
    feats = jnp.dot(patches_ref[...].astype(bf16), conv_w_ref[...],
                    preferred_element_type=jnp.float32) + conv_b_ref[...]
    feats = jnp.maximum(feats, 0.0)                              # (n_seq*T, 256) f32
    c = feats.shape[-1]

    # ---- attention pooling: e = tanh(xW) @ (V*scale), softmax over time per sequence
    t = jnp.tanh(jnp.dot(feats.astype(bf16), att_w_ref[...],
                         preferred_element_type=jnp.float32))    # (n_seq*T, 256) f32
    feats3 = feats.reshape(n_seq, seq_len, c)                    # split leading dim only
    t3 = t.reshape(n_seq, seq_len, ATT_DIM)
    # scale folded into att_v on the host; V presented as a (1, 256) row -> mul + lane reduce
    e = jnp.sum(t3 * att_v_ref[...], axis=-1, keepdims=True)     # (n_seq, T, 1)
    m = jnp.max(e, axis=1, keepdims=True)                        # per-sequence max (stability)
    n1 = jnp.exp(e - m)
    inv_denom = pl.reciprocal(jnp.sum(n1, axis=1), approx=True)  # (n_seq, 1), EUP slot
    pooled = jnp.sum(n1 * feats3, axis=1) * inv_denom            # (n_seq, 256) f32

    # ---- projection head layer 1: Linear(256, H) -> ReLU
    h = jnp.dot(pooled.astype(bf16), pw1_ref[...],
                preferred_element_type=jnp.float32) + pb1_ref[...]
    h = jnp.maximum(h, 0.0)

    # ---- proj output + predictor layer-1 pre-activation in ONE N=2H matmul
    # pw2cat = [proj_w2 | proj_w2 @ pred_w1], pb2cat = [proj_b2 | proj_b2 @ pred_w1 + pred_b1]
    big = jnp.dot(h.astype(bf16), pw2cat_ref[...],
                  preferred_element_type=jnp.float32) + pb2cat_ref[...]   # (n_seq, 2H)
    proj = big[:, :hidden]
    h2 = jnp.maximum(big[:, hidden:], 0.0)

    # ---- predictor layer 2
    pred = jnp.dot(h2.astype(bf16), qw2_ref[...],
                   preferred_element_type=jnp.float32) + qb2_ref[...]     # (n_seq, H)

    # single lane-dense (n_seq, 2H) store: [proj | pred]
    out_ref[...] = jnp.concatenate([proj, pred], axis=-1)


def fused_forward(kp, patches, *, n_seq, seq_len, hidden):
    """Run the whole sleep_model forward for n_seq pooled sequences in one kernel."""
    inputs = (patches, kp["conv_w"], kp["conv_b"],
              kp["att_W"], kp["att_V_row"],
              kp["proj_w1"], kp["proj_b1"], kp["proj_w2_cat"], kp["proj_b2_cat"],
              kp["pred_w2"], kp["pred_b2"])

    def full_spec(x):                         # whole (rank-2) array as a single block
        return pl.BlockSpec(x.shape, lambda i: (0, 0))

    out = pl.pallas_call(
        functools.partial(_fused_forward_kernel,
                          n_seq=n_seq, seq_len=seq_len, hidden=hidden),
        out_shape=jax.ShapeDtypeStruct((n_seq, 2 * hidden), jnp.float32),
        grid=(1,),
        in_specs=[full_spec(x) for x in inputs],
        out_specs=pl.BlockSpec((n_seq, 2 * hidden), lambda i: (0, 0)),
        compiler_params=pltpu.CompilerParams(dimension_semantics=("arbitrary",)),
    )(*inputs)
    return out[:, :hidden], out[:, hidden:]


# --------------------------- host-side param prep -----------------------------

def prepare_kernel_params(p):
    """One-time host-side prep (amortized across forward calls): bf16 weight casts,
    attention scale folded into V, proj->pred layer-1 composition."""
    bf16, f32 = jnp.bfloat16, jnp.float32
    scale = float(ATT_DIM) ** (-0.5)
    # (h @ pw2 + pb2) @ qw1 + qb1  ==  h @ (pw2 @ qw1) + (pb2 @ qw1 + qb1)
    w_comp = p["proj_w2"] @ p["pred_w1"]
    b_comp = p["proj_b2"] @ p["pred_w1"] + p["pred_b1"]
    return {
        "conv_w": p["conv_w"].astype(bf16),
        "conv_b": p["conv_b"].astype(f32),
        "att_W": p["att_W"].astype(bf16),
        "att_V_row": (p["att_V"].reshape(1, ATT_DIM) * scale).astype(f32),
        "proj_w1": p["proj_w1"].astype(bf16),
        "proj_b1": p["proj_b1"].astype(f32),
        "proj_w2_cat": jnp.concatenate([p["proj_w2"], w_comp], axis=1).astype(bf16),
        "proj_b2_cat": jnp.concatenate([p["proj_b2"], b_comp], axis=1).astype(f32),
        "pred_w2": p["pred_w2"].astype(bf16),
        "pred_b2": p["pred_b2"].astype(f32),
    }


# --------------------------- model glue ---------------------------------------

def sleep_model_forward(kp, weak, strong, *, config):
    mid = config.epoch_len // 2
    B, _, L = weak.shape
    T = L // PATCH
    H = config.tc_hidden_dim

    # plain-JAX glue (tiny): central-epoch slice, weak || strong batched along M,
    # conv stride == kernel so patch extraction is a pure reshape (kept host-side).
    x = jnp.concatenate([weak[:, mid, :], strong[:, mid, :]], axis=0)   # (2B, L)
    patches = x.reshape(2 * B * T, PATCH)                               # (2B*T, 32)

    proj_all, pred_all = fused_forward(kp, patches, n_seq=2 * B, seq_len=T, hidden=H)
    proj1, proj2 = proj_all[:B], proj_all[B:]
    pred1, pred2 = pred_all[:B], pred_all[B:]
    return pred1, pred2, proj1, proj2


def init_params(key, config):
    H = config.tc_hidden_dim
    ks = jax.random.split(key, 8)
    f32 = jnp.float32
    p = {
        # BaseNet stand-in (Conv1d as matmul): (kernel, out_ch)
        "conv_w": jax.random.normal(ks[0], (PATCH, ATT_DIM), f32) / jnp.sqrt(PATCH).astype(f32),
        "conv_b": jnp.zeros((1, ATT_DIM), f32),
        # attention: W = randn(256, 256), V = randn(256, 1)  (as in the PyTorch module)
        "att_W": jax.random.normal(ks[1], (ATT_DIM, ATT_DIM), f32),
        "att_V": jax.random.normal(ks[2], (ATT_DIM, 1), f32),
        # projection_head: Linear(256, H) -> ReLU -> Linear(H, H)
        "proj_w1": jax.random.normal(ks[3], (ATT_DIM, H), f32) / jnp.sqrt(ATT_DIM).astype(f32),
        "proj_b1": jnp.zeros((1, H), f32),
        "proj_w2": jax.random.normal(ks[4], (H, H), f32) / jnp.sqrt(H).astype(f32),
        "proj_b2": jnp.zeros((1, H), f32),
        # predictor_head: Linear(H, H) -> ReLU -> Linear(H, H)
        "pred_w1": jax.random.normal(ks[5], (H, H), f32) / jnp.sqrt(H).astype(f32),
        "pred_b1": jnp.zeros((1, H), f32),
        "pred_w2": jax.random.normal(ks[6], (H, H), f32) / jnp.sqrt(H).astype(f32),
        "pred_b2": jnp.zeros((1, H), f32),
    }
    return p


if __name__ == "__main__":
    config = Config()
    B, L = 2, 256

    key = jax.random.PRNGKey(0)
    kp, kw, ks = jax.random.split(key, 3)
    params = init_params(kp, config)

    # one-time prep: bf16 casts, scale fold, proj->pred composition (amortized)
    kparams = jax.tree_util.tree_map(jnp.asarray, prepare_kernel_params(params))

    weak_data = jax.random.normal(kw, (B, config.epoch_len, L), jnp.float32)
    strong_data = jax.random.normal(ks, (B, config.epoch_len, L), jnp.float32)

    fwd = jax.jit(functools.partial(sleep_model_forward, config=config))
    pred1, pred2, proj1, proj2 = fwd(kparams, weak_data, strong_data)
    jax.block_until_ready((pred1, pred2, proj1, proj2))

    assert pred1.shape == (B, config.tc_hidden_dim)
    assert pred2.shape == (B, config.tc_hidden_dim)
    assert proj1.shape == (B, config.tc_hidden_dim)
    assert proj2.shape == (B, config.tc_hidden_dim)
    assert bool(jnp.all(jnp.isfinite(pred1))) and bool(jnp.all(jnp.isfinite(proj1)))
    assert bool(jnp.all(jnp.isfinite(pred2))) and bool(jnp.all(jnp.isfinite(proj2)))
    print("KERNEL_OK")
</pallas_src>

<mosaic_0001>
module attributes {stable_mosaic.version = 11 : i64} {
  func.func @_fused_forward_kernel(%arg0: i32, %arg1: memref<32x32xf32, #tpu.memory_space<vmem>>, %arg2: memref<32x256xbf16, #tpu.memory_space<vmem>>, %arg3: memref<1x256xf32, #tpu.memory_space<vmem>>, %arg4: memref<256x256xbf16, #tpu.memory_space<vmem>>, %arg5: memref<1x256xf32, #tpu.memory_space<vmem>>, %arg6: memref<256x128xbf16, #tpu.memory_space<vmem>>, %arg7: memref<1x128xf32, #tpu.memory_space<vmem>>, %arg8: memref<128x256xbf16, #tpu.memory_space<vmem>>, %arg9: memref<1x256xf32, #tpu.memory_space<vmem>>, %arg10: memref<128x128xbf16, #tpu.memory_space<vmem>>, %arg11: memref<1x128xf32, #tpu.memory_space<vmem>>, %arg12: memref<4x256xf32, #tpu.memory_space<vmem>>) attributes {dimension_semantics = [#tpu.dimension_semantics<arbitrary>], iteration_bounds = array<i64: 1>, scalar_prefetch = 0 : i64, scratch_operands = 0 : i64, tpu.core_type = #tpu.core_type<tc>, window_params = [{pipeline_mode = #tpu.pipeline_mode<synchronous>, transform_indices = @transform_0, window_bounds = array<i64: 32, 32>}, {pipeline_mode = #tpu.pipeline_mode<synchronous>, transform_indices = @transform_1, window_bounds = array<i64: 32, 256>}, {pipeline_mode = #tpu.pipeline_mode<synchronous>, transform_indices = @transform_2, window_bounds = array<i64: 1, 256>}, {pipeline_mode = #tpu.pipeline_mode<synchronous>, transform_indices = @transform_3, window_bounds = array<i64: 256, 256>}, {pipeline_mode = #tpu.pipeline_mode<synchronous>, transform_indices = @transform_4, window_bounds = array<i64: 1, 256>}, {pipeline_mode = #tpu.pipeline_mode<synchronous>, transform_indices = @transform_5, window_bounds = array<i64: 256, 128>}, {pipeline_mode = #tpu.pipeline_mode<synchronous>, transform_indices = @transform_6, window_bounds = array<i64: 1, 128>}, {pipeline_mode = #tpu.pipeline_mode<synchronous>, transform_indices = @transform_7, window_bounds = array<i64: 128, 256>}, {pipeline_mode = #tpu.pipeline_mode<synchronous>, transform_indices = @transform_8, window_bounds = array<i64: 1, 256>}, {pipeline_mode = #tpu.pipeline_mode<synchronous>, transform_indices = @transform_9, window_bounds = array<i64: 128, 128>}, {pipeline_mode = #tpu.pipeline_mode<synchronous>, transform_indices = @transform_10, window_bounds = array<i64: 1, 128>}, {pipeline_mode = #tpu.pipeline_mode<synchronous>, transform_indices = @transform_11, window_bounds = array<i64: 4, 256>}]} {
    %c0 = arith.constant 0 : index
    %c0_0 = arith.constant 0 : index
    %0 = vector.load %arg1[%c0, %c0_0] : memref<32x32xf32, #tpu.memory_space<vmem>>, vector<32x32xf32>
    %1 = arith.truncf %0 : vector<32x32xf32> to vector<32x32xbf16>
    %c0_1 = arith.constant 0 : index
    %c0_2 = arith.constant 0 : index
    %2 = vector.load %arg2[%c0_1, %c0_2] : memref<32x256xbf16, #tpu.memory_space<vmem>>, vector<32x256xbf16>
    %cst = arith.constant dense<0.000000e+00> : vector<32x256xf32>
    %3 = tpu.matmul %1, %2, %cst {dimension_numbers = #tpu.dot_dimension_numbers<[1], [0], [0], [1], [0, 0, 1, 1], [], []>} : vector<32x32xbf16>, vector<32x256xbf16>, vector<32x256xf32> -> vector<32x256xf32>
    %c0_3 = arith.constant 0 : index
    %c0_4 = arith.constant 0 : index
    %4 = vector.load %arg3[%c0_3, %c0_4] : memref<1x256xf32, #tpu.memory_space<vmem>>, vector<1x256xf32>
    %5 = vector.broadcast %4 : vector<1x256xf32> to vector<32x256xf32>
    %6 = arith.addf %3, %5 : vector<32x256xf32>
    %cst_5 = arith.constant 0.000000e+00 : f32
    %7 = vector.broadcast %cst_5 : f32 to vector<32x256xf32>
    %8 = arith.maximumf %6, %7 : vector<32x256xf32>
    %9 = arith.truncf %8 : vector<32x256xf32> to vector<32x256xbf16>
    %c0_6 = arith.constant 0 : index
    %c0_7 = arith.constant 0 : index
    %10 = vector.load %arg4[%c0_6, %c0_7] : memref<256x256xbf16, #tpu.memory_space<vmem>>, vector<256x256xbf16>
    %cst_8 = arith.constant dense<0.000000e+00> : vector<32x256xf32>
    %11 = tpu.matmul %9, %10, %cst_8 {dimension_numbers = #tpu.dot_dimension_numbers<[1], [0], [0], [1], [0, 0, 1, 1], [], []>} : vector<32x256xbf16>, vector<256x256xbf16>, vector<32x256xf32> -> vector<32x256xf32>
    %12 = math.tanh %11 : vector<32x256xf32>
    %13 = vector.shape_cast %8 : vector<32x256xf32> to vector<4x8x256xf32>
    %14 = vector.shape_cast %12 : vector<32x256xf32> to vector<4x8x256xf32>
    %c0_9 = arith.constant 0 : index
    %c0_10 = arith.constant 0 : index
    %15 = vector.load %arg5[%c0_9, %c0_10] : memref<1x256xf32, #tpu.memory_space<vmem>>, vector<1x256xf32>
    %16 = vector.shape_cast %15 : vector<1x256xf32> to vector<1x1x256xf32>
    %17 = vector.broadcast %16 : vector<1x1x256xf32> to vector<4x8x256xf32>
    %18 = arith.mulf %14, %17 : vector<4x8x256xf32>
    %cst_11 = arith.constant dense<0.000000e+00> : vector<4x8xf32>
    %19 = vector.multi_reduction <add>, %18, %cst_11 [2] : vector<4x8x256xf32> to vector<4x8xf32>
    %20 = vector.shape_cast %19 : vector<4x8xf32> to vector<4x8x1xf32>
    %cst_12 = arith.constant dense<0xFF800000> : vector<4x1xf32>
    %21 = vector.multi_reduction <maximumf>, %20, %cst_12 [1] : vector<4x8x1xf32> to vector<4x1xf32>
    %22 = vector.shape_cast %21 : vector<4x1xf32> to vector<4x1x1xf32>
    %23 = vector.broadcast %22 : vector<4x1x1xf32> to vector<4x8x1xf32>
    %24 = arith.subf %20, %23 : vector<4x8x1xf32>
    %25 = math.exp %24 : vector<4x8x1xf32>
    %cst_13 = arith.constant dense<0.000000e+00> : vector<4x1xf32>
    %26 = vector.multi_reduction <add>, %25, %cst_13 [1] : vector<4x8x1xf32> to vector<4x1xf32>
    %27 = tpu.reciprocal %26 {approx = true} : vector<4x1xf32> -> vector<4x1xf32>
    %28 = vector.broadcast %25 : vector<4x8x1xf32> to vector<4x8x256xf32>
    %29 = arith.mulf %28, %13 : vector<4x8x256xf32>
    %cst_14 = arith.constant dense<0.000000e+00> : vector<4x256xf32>
    %30 = vector.multi_reduction <add>, %29, %cst_14 [1] : vector<4x8x256xf32> to vector<4x256xf32>
    %31 = vector.broadcast %27 : vector<4x1xf32> to vector<4x256xf32>
    %32 = arith.mulf %30, %31 : vector<4x256xf32>
    %33 = arith.truncf %32 : vector<4x256xf32> to vector<4x256xbf16>
    %c0_15 = arith.constant 0 : index
    %c0_16 = arith.constant 0 : index
    %34 = vector.load %arg6[%c0_15, %c0_16] : memref<256x128xbf16, #tpu.memory_space<vmem>>, vector<256x128xbf16>
    %cst_17 = arith.constant dense<0.000000e+00> : vector<4x128xf32>
    %35 = tpu.matmul %33, %34, %cst_17 {dimension_numbers = #tpu.dot_dimension_numbers<[1], [0], [0], [1], [0, 0, 1, 1], [], []>} : vector<4x256xbf16>, vector<256x128xbf16>, vector<4x128xf32> -> vector<4x128xf32>
    %c0_18 = arith.constant 0 : index
    %c0_19 = arith.constant 0 : index
    %36 = vector.load %arg7[%c0_18, %c0_19] : memref<1x128xf32, #tpu.memory_space<vmem>>, vector<1x128xf32>
    %37 = vector.broadcast %36 : vector<1x128xf32> to vector<4x128xf32>
    %38 = arith.addf %35, %37 : vector<4x128xf32>
    %cst_20 = arith.constant 0.000000e+00 : f32
    %39 = vector.broadcast %cst_20 : f32 to vector<4x128xf32>
    %40 = arith.maximumf %38, %39 : vector<4x128xf32>
    %41 = arith.truncf %40 : vector<4x128xf32> to vector<4x128xbf16>
    %c0_21 = arith.constant 0 : index
    %c0_22 = arith.constant 0 : index
    %42 = vector.load %arg8[%c0_21, %c0_22] : memref<128x256xbf16, #tpu.memory_space<vmem>>, vector<128x256xbf16>
    %cst_23 = arith.constant dense<0.000000e+00> : vector<4x256xf32>
    %43 = tpu.matmul %41, %42, %cst_23 {dimension_numbers = #tpu.dot_dimension_numbers<[1], [0], [0], [1], [0, 0, 1, 1], [], []>} : vector<4x128xbf16>, vector<128x256xbf16>, vector<4x256xf32> -> vector<4x256xf32>
    %c0_24 = arith.constant 0 : index
    %c0_25 = arith.constant 0 : index
    %44 = vector.load %arg9[%c0_24, %c0_25] : memref<1x256xf32, #tpu.memory_space<vmem>>, vector<1x256xf32>
    %45 = vector.broadcast %44 : vector<1x256xf32> to vector<4x256xf32>
    %46 = arith.addf %43, %45 : vector<4x256xf32>
    %47 = vector.extract_strided_slice %46 {offsets = [0, 0], sizes = [4, 128], strides = [1, 1]} : vector<4x256xf32> to vector<4x128xf32>
    %48 = vector.extract_strided_slice %46 {offsets = [0, 128], sizes = [4, 128], strides = [1, 1]} : vector<4x256xf32> to vector<4x128xf32>
    %cst_26 = arith.constant 0.000000e+00 : f32
    %49 = vector.broadcast %cst_26 : f32 to vector<4x128xf32>
    %50 = arith.maximumf %48, %49 : vector<4x128xf32>
    %51 = arith.truncf %50 : vector<4x128xf32> to vector<4x128xbf16>
    %c0_27 = arith.constant 0 : index
    %c0_28 = arith.constant 0 : index
    %52 = vector.load %arg10[%c0_27, %c0_28] : memref<128x128xbf16, #tpu.memory_space<vmem>>, vector<128x128xbf16>
    %cst_29 = arith.constant dense<0.000000e+00> : vector<4x128xf32>
    %53 = tpu.matmul %51, %52, %cst_29 {dimension_numbers = #tpu.dot_dimension_numbers<[1], [0], [0], [1], [0, 0, 1, 1], [], []>} : vector<4x128xbf16>, vector<128x128xbf16>, vector<4x128xf32> -> vector<4x128xf32>
    %c0_30 = arith.constant 0 : index
    %c0_31 = arith.constant 0 : index
    %54 = vector.load %arg11[%c0_30, %c0_31] : memref<1x128xf32, #tpu.memory_space<vmem>>, vector<1x128xf32>
    %55 = vector.broadcast %54 : vector<1x128xf32> to vector<4x128xf32>
    %56 = arith.addf %53, %55 : vector<4x128xf32>
    %57 = tpu.concatenate %47, %56 in 1 : vector<4x128xf32>, vector<4x128xf32> -> vector<4x256xf32>
    %c0_32 = arith.constant 0 : index
    %c0_33 = arith.constant 0 : index
    %58 = vector.load %arg12[%c0_32, %c0_33] : memref<4x256xf32, #tpu.memory_space<vmem>>, vector<4x256xf32>
    tpu.vector_store %arg12[%c0_32, %c0_33], %57 {strides = array<i32>} : memref<4x256xf32, #tpu.memory_space<vmem>>, vector<4x256xf32>,
    return
  }
  func.func @transform_0(%arg0: i32) -> (i32, i32) {
    %c0_i32 = arith.constant 0 : i32
    %c0_i32_0 = arith.constant 0 : i32
    %c0_i32_1 = arith.constant 0 : i32
    return %c0_i32, %c0_i32_0 : i32, i32
  }
  func.func @transform_1(%arg0: i32) -> (i32, i32) {
    %c0_i32 = arith.constant 0 : i32
    %c0_i32_0 = arith.constant 0 : i32
    %c0_i32_1 = arith.constant 0 : i32
    return %c0_i32, %c0_i32_0 : i32, i32
  }
  func.func @transform_2(%arg0: i32) -> (i32, i32) {
    %c0_i32 = arith.constant 0 : i32
    %c0_i32_0 = arith.constant 0 : i32
    %c0_i32_1 = arith.constant 0 : i32
    return %c0_i32, %c0_i32_0 : i32, i32
  }
  func.func @transform_3(%arg0: i32) -> (i32, i32) {
    %c0_i32 = arith.constant 0 : i32
    %c0_i32_0 = arith.constant 0 : i32
    %c0_i32_1 = arith.constant 0 : i32
    return %c0_i32, %c0_i32_0 : i32, i32
  }
  func.func @transform_4(%arg0: i32) -> (i32, i32) {
    %c0_i32 = arith.constant 0 : i32
    %c0_i32_0 = arith.constant 0 : i32
    %c0_i32_1 = arith.constant 0 : i32
    return %c0_i32, %c0_i32_0 : i32, i32
  }
  func.func @transform_5(%arg0: i32) -> (i32, i32) {
    %c0_i32 = arith.constant 0 : i32
    %c0_i32_0 = arith.constant 0 : i32
    %c0_i32_1 = arith.constant 0 : i32
    return %c0_i32, %c0_i32_0 : i32, i32
  }
  func.func @transform_6(%arg0: i32) -> (i32, i32) {
    %c0_i32 = arith.constant 0 : i32
    %c0_i32_0 = arith.constant 0 : i32
    %c0_i32_1 = arith.constant 0 : i32
    return %c0_i32, %c0_i32_0 : i32, i32
  }
  func.func @transform_7(%arg0: i32) -> (i32, i32) {
    %c0_i32 = arith.constant 0 : i32
    %c0_i32_0 = arith.constant 0 : i32
    %c0_i32_1 = arith.constant 0 : i32
    return %c0_i32, %c0_i32_0 : i32, i32
  }
  func.func @transform_8(%arg0: i32) -> (i32, i32) {
    %c0_i32 = arith.constant 0 : i32
    %c0_i32_0 = arith.constant 0 : i32
    %c0_i32_1 = arith.constant 0 : i32
    return %c0_i32, %c0_i32_0 : i32, i32
  }
  func.func @transform_9(%arg0: i32) -> (i32, i32) {
    %c0_i32 = arith.constant 0 : i32
    %c0_i32_0 = arith.constant 0 : i32
    %c0_i32_1 = arith.constant 0 : i32
    return %c0_i32, %c0_i32_0 : i32, i32
  }
  func.func @transform_10(%arg0: i32) -> (i32, i32) {
    %c0_i32 = arith.constant 0 : i32
    %c0_i32_0 = arith.constant 0 : i32
    %c0_i32_1 = arith.constant 0 : i32
    return %c0_i32, %c0_i32_0 : i32, i32
  }
  func.func @transform_11(%arg0: i32) -> (i32, i32) {
    %c0_i32 = arith.constant 0 : i32
    %c0_i32_0 = arith.constant 0 : i32
    %c0_i32_1 = arith.constant 0 : i32
    return %c0_i32, %c0_i32_0 : i32, i32
  }
}

</mosaic_0001>

<bundles_post_ra>
// kernel: sleep_model_forward.1
= control target key start
LH: loop header
LB: loop body
LE: loop exit
PB: predicated region body
PF: predicated region fallthrough
CT: control target
= control target key end

     0   :  { %16 = vsyncpa [#allocation3], 0  ;;  %s1775_s0 = inlined_call_operand.vmem [shape: f32[32,32], index: 0, kind: input, shape index: {}]   ;;  %s1776_s1 = inlined_call_operand.hbm [shape: bf16[32,256], index: 1, kind: input, shape index: {}]   ;;  %s1777_s2 = inlined_call_operand.vmem [shape: f32[1,256], index: 2, kind: input, shape index: {}]   ;;  %s1778_s3 = inlined_call_operand.hbm [shape: bf16[256,256], index: 3, kind: input, shape index: {}]   ;;  %s1779_s4 = inlined_call_operand.vmem [shape: f32[1,256], index: 4, kind: input, shape index: {}]   ;;  %s1780_s5 = inlined_call_operand.hbm [shape: bf16[256,128], index: 5, kind: input, shape index: {}]   ;;  %s1781_s6 = inlined_call_operand.vmem [shape: f32[1,128], index: 6, kind: input, shape index: {}]   ;;  %s1782_s7 = inlined_call_operand.hbm [shape: bf16[128,256], index: 7, kind: input, shape index: {}]   ;;  %s1783_s8 = inlined_call_operand.vmem [shape: f32[1,256], index: 8, kind: input, shape index: {}]   ;;  %s1784_s9 = inlined_call_operand.vmem [shape: bf16[128,128], index: 9, kind: input, shape index: {}]   ;;  %s1785_s10 = inlined_call_operand.vmem [shape: f32[1,128], index: 10, kind: input, shape index: {}]   ;;  %s1786_s11 = inlined_call_operand.vmem [shape: f32[4,256], index: 11, kind: output, shape index: {}]  }
   0x1   :  { %17 = vsyncpa [#allocation5], 0 }
   0x2   :  { %18 = vsyncpa [#allocation8], 0  ;;  %s40_s19 = sshll.u32 %s1778_s3, 4  ;;  %s1575_s20 = smov [#allocation4]   ;;  %s41_s19 = int_to_ptr.hbm [resolvable:$true] %s40_s19 }
   0x3   :  { %s42_s21 = sshll.u32 %s1575_s20, 4  ;;  %s25_s24 = sshll.u32 %s1776_s1, 4  ;;  %s43_s21 = int_to_ptr.vmem [resolvable:$true] %s42_s21  ;;  %s26_s24 = int_to_ptr.hbm [resolvable:$true] %s25_s24 }
   0x4   :  { %s1576_s25 = smov 128   ;;  %s1577_s26 = smov 8  }
   0x5   :  { %48 = dma.hbm_to_vmem [thread:$0]  %s41_s19, 4096, %s43_s21, [#allocation5], %s1576_s25, %s1576_s25, %s1577_s26  }
   0x6   :  { %s1578_s27 = smov [#allocation2]   ;;  %s55_s12 = sshll.u32 %s1780_s5, 4  ;;  %s56_s12 = int_to_ptr.hbm [resolvable:$true] %s55_s12 }
   0x7   :  { %s27_s28 = sshll.u32 %s1578_s27, 4  ;;  %s1579_s3 = smov [#allocation6]   ;;  %s28_s28 = int_to_ptr.vmem [resolvable:$true] %s27_s28 }
   0x8   :  { %33 = dma.hbm_to_vmem [thread:$0]  %s26_s24, 512, %s28_s28, [#allocation3], %s1576_s25, %s1576_s25, %s1577_s26  }
   0x9   :  { %s57_s13 = sshll.u32 %s1579_s3, 4  ;;  %s70_s1 = sshll.u32 %s1782_s7, 4  ;;  %s58_s13 = int_to_ptr.vmem [resolvable:$true] %s57_s13  ;;  %s71_s1 = int_to_ptr.hbm [resolvable:$true] %s70_s1 }
   0xa   :  { %s1580_s16 = smov 64   ;;  %s1581_s17 = smov 4  }
   0xb   :  { %63 = dma.hbm_to_vmem [thread:$0]  %s56_s12, 2048, %s58_s13, [#allocation5], %s1580_s16, %s1580_s16, %s1581_s17  }
   0xc   :  { %s1582_s18 = smov [#allocation7]  }
   0xd   :  { %s72_s19 = sshll.u32 %s1582_s18, 4  ;;  %s73_s19 = int_to_ptr.vmem [resolvable:$true] %s72_s19 }
   0xe   :  { %78 = dma.hbm_to_vmem [thread:$0]  %s71_s1, 2048, %s73_s19, [#allocation8], %s1576_s25, %s1576_s25, %s1577_s26  }
   0xf   :  { %1569 = dma.done.wait [#allocation3], 512  }
  0x10   :  { %1570 = vsyncadd [#allocation3], 4294966784 }
  0x11   :  { %1571 = dma.done.wait [#allocation5], 6144  }
  0x12   :  { %1572 = vsyncadd [#allocation5], 4294961152 }
  0x13   :  { %1573 = dma.done.wait [#allocation8], 2048  }
  0x14   :  { %1574 = vsyncadd [#allocation8], 4294965248  ;;  %v1057_v0 = vld [vmem:[#allocation2 + $0x10] sm:$0xf]  ;;  %v1358_v1 = vld [vmem:[#allocation2 + $0x14] sm:$0xf0] }
  0x15   :  { %v1357_v2 = vld [vmem:[#allocation2 + $0x14] sm:$0xf]  ;;  %v1058_v3 = vor.u32 %v1358_v1, %v1057_v0  ;;  %v1059_v4 = vld [vmem:[#allocation2 + $0x18] sm:$0xf0]  ;;  %v1049_v5 = vld [vmem:[#allocation2] sm:$0xf] }
  0x16   :  { %v1356_v6 = vld [vmem:[#allocation2 + $0x4] sm:$0xf0]  ;;  %v1062_v7 = vor.u32 %v1357_v2, %v1059_v4  ;;  %v1355_v8 = vld [vmem:[#allocation2 + $0x4] sm:$0xf]  ;;  %v1051_v9 = vld [vmem:[#allocation2 + $0x8] sm:$0xf0] }
  0x17   :  { %151 = vmatpush.bf16.msra.mxu0 %v1058_v3  ;;  %v1050_v10 = vor.u32 %v1356_v6, %v1049_v5  ;;  %v102_v11 = vld [vmem:[%s1775_s0] sm:$0xff]  ;;  %v103_v12 = vld [vmem:[%s1775_s0 + $0x8] sm:$0xff]  ;;  %vm138_vm0 = vcmask 261120   ;;  %v1054_v13 = vor.u32 %v1355_v8, %v1051_v9  ;;  %v1125_v14 = vld [vmem:[#allocation4 + $0x70] sm:$0xf]  ;;  %vm685_vm1 = vcmask 1041409  }
  0x18   :  { %170 = vmatpush.bf16.msra.mxu1 %v1062_v7  ;;  %v1374_v15 = vld [vmem:[#allocation4 + $0x74] sm:$0xf0]  ;;  %v1189_v16 = vld [vmem:[#allocation4 + $0xf0] sm:$0xf]  ;;  %v1373_v19 = vld [vmem:[#allocation4 + $0x74] sm:$0xf]  ;;  %v106_v21 = vpack.c.bf16 %v103_v12, %v102_v11 }
  0x19   :  { %v1126_v17 = vor.u32 %v1374_v15, %v1125_v14  ;;  %v1390_v18 = vld [vmem:[#allocation4 + $0xf4] sm:$0xf0]  ;;  %v1127_v20 = vld [vmem:[#allocation4 + $0x78] sm:$0xf0]  ;;  %v1389_v24 = vld [vmem:[#allocation4 + $0xf4] sm:$0xf] }
  0x1a   :  { %v1190_v22 = vor.u32 %v1390_v18, %v1189_v16  ;;  %v1130_v23 = vor.u32 %v1373_v19, %v1127_v20  ;;  %v1191_v25 = vld [vmem:[#allocation4 + $0xf8] sm:$0xf0]  ;;  %v1117_v26 = vld [vmem:[#allocation4 + $0x60] sm:$0xf]  ;;  %v1372_v28 = vld [vmem:[#allocation4 + $0x64] sm:$0xf0] }
  0x1b   :  { %152 = vmatpush.bf16.msra.mxu0 %v1050_v10  ;;  %387 = vmatpush.bf16.msra.mxu2 %v1126_v17  ;;  %v1194_v27 = vor.u32 %v1389_v24, %v1191_v25  ;;  %v1181_v29 = vld [vmem:[#allocation4 + $0xe0] sm:$0xf]  ;;  %v1388_v30 = vld [vmem:[#allocation4 + $0xe4] sm:$0xf0]  ;;  %v1118_v31 = vor.u32 %v1372_v28, %v1117_v26  ;;  %v1371_v33 = vld [vmem:[#allocation4 + $0x64] sm:$0xf] }
  0x1c   :  { %171 = vmatpush.bf16.msra.mxu1 %v1054_v13  ;;  %406 = vmatpush.bf16.msra.mxu3 %v1190_v22  ;;  %v1182_v32 = vor.u32 %v1388_v30, %v1181_v29  ;;  %v1119_v34 = vld [vmem:[#allocation4 + $0x68] sm:$0xf0]  ;;  %v1387_v35 = vld [vmem:[#allocation4 + $0xe4] sm:$0xf]  ;;  %v1109_v38 = vld [vmem:[#allocation4 + $0x50] sm:$0xf] }
  0x1d   :  { %v1122_v36 = vor.u32 %v1371_v33, %v1119_v34  ;;  %v1183_v37 = vld [vmem:[#allocation4 + $0xe8] sm:$0xf0]  ;;  %v1370_v39 = vld [vmem:[#allocation4 + $0x54] sm:$0xf0]  ;;  %v1173_v41 = vld [vmem:[#allocation4 + $0xd0] sm:$0xf] }
  0x1e   :  { %1063 = vmatmul.msk.bf16.vlgmr.msra.gmra.mxu0 %vm138_vm0, %v106_v21  ;;  %v1186_v40 = vor.u32 %v1387_v35, %v1183_v37  ;;  %v1386_v42 = vld [vmem:[#allocation4 + $0xd4] sm:$0xf0]  ;;  %v1369_v43 = vld [vmem:[#allocation4 + $0x54] sm:$0xf]  ;;  %v1110_v44 = vor.u32 %v1370_v39, %v1109_v38  ;;  %v1111_v45 = vld [vmem:[#allocation4 + $0x58] sm:$0xf0] }
  0x1f   :  { %425 = vmatpush.bf16.msrb.mxu0 %v1130_v23  ;;  %1065 = vmatmul.msk.bf16.vlgmr.msra.gmra.mxu1 %vm138_vm0, %v106_v21  ;;  %v1385_v46 = vld [vmem:[#allocation4 + $0xd4] sm:$0xf]  ;;  %v1175_v47 = vld [vmem:[#allocation4 + $0xd8] sm:$0xf0]  ;;  %v1174_v48 = vor.u32 %v1386_v42, %v1173_v41  ;;  %v1101_v49 = vld [vmem:[#allocation4 + $0x40] sm:$0xf]  ;;  %v1114_v51 = vor.u32 %v1369_v43, %v1111_v45 }
  0x20   :  { %444 = vmatpush.bf16.msrb.mxu1 %v1194_v27  ;;  %388 = vmatpush.bf16.msra.mxu2 %v1118_v31  ;;  %v1368_v50 = vld [vmem:[#allocation4 + $0x44] sm:$0xf0]  ;;  %v1178_v52 = vor.u32 %v1385_v46, %v1175_v47  ;;  %v1165_v53 = vld [vmem:[#allocation4 + $0xc0] sm:$0xf]  ;;  %v1367_v55 = vld [vmem:[#allocation4 + $0x44] sm:$0xf] }
  0x21   :  { %407 = vmatpush.bf16.msra.mxu3 %v1182_v32  ;;  %v1384_v54 = vld [vmem:[#allocation4 + $0xc4] sm:$0xf0]  ;;  %v1103_v56 = vld [vmem:[#allocation4 + $0x48] sm:$0xf0]  ;;  %v1383_v57 = vld [vmem:[#allocation4 + $0xc4] sm:$0xf]  ;;  %v1102_v59 = vor.u32 %v1368_v50, %v1101_v49 }
  0x22   :  { %v1167_v58 = vld [vmem:[#allocation4 + $0xc8] sm:$0xf0]  ;;  %v1166_v60 = vor.u32 %v1384_v54, %v1165_v53  ;;  %v1106_v61 = vor.u32 %v1367_v55, %v1103_v56  ;;  %v104_v63 = vld [vmem:[%s1775_s0 + $0x10] sm:$0xff]  ;;  %v105_v0 = vld [vmem:[%s1775_s0 + $0x18] sm:$0xff]  ;;  %vm687_vm2 = vcmask 1042434   ;;  %vm689_vm3 = vcmask 1043459  }
  0x23   :  { %426 = vmatpush.bf16.msrb.mxu0 %v1122_v36  ;;  %v1170_v62 = vor.u32 %v1383_v57, %v1167_v58  ;;  %v107_v1 = vpack.c.bf16 %v105_v0, %v104_v63  ;;  %v1093_v2 = vld [vmem:[#allocation4 + $0x30] sm:$0xf]  ;;  %v1366_v3 = vld [vmem:[#allocation4 + $0x34] sm:$0xf0]  ;;  %v1365_v7 = vld [vmem:[#allocation4 + $0x34] sm:$0xf] }
  0x24   :  { %445 = vmatpush.bf16.msrb.mxu1 %v1186_v40  ;;  %389 = vmatpush.bf16.msra.mxu2 %v1110_v44  ;;  %v1157_v4 = vld [vmem:[#allocation4 + $0xb0] sm:$0xf]  ;;  %v1094_v5 = vor.u32 %v1366_v3, %v1093_v2  ;;  %v1382_v6 = vld [vmem:[#allocation4 + $0xb4] sm:$0xf0]  ;;  %v1095_v8 = vld [vmem:[#allocation4 + $0x38] sm:$0xf0] }
  0x25   :  { %408 = vmatpush.bf16.msra.mxu3 %v1174_v48  ;;  %v1158_v9 = vor.u32 %v1382_v6, %v1157_v4  ;;  %v1098_v10 = vor.u32 %v1365_v7, %v1095_v8  ;;  %v1381_v11 = vld [vmem:[#allocation4 + $0xb4] sm:$0xf]  ;;  %v1159_v12 = vld [vmem:[#allocation4 + $0xb8] sm:$0xf0]  ;;  %v1085_v14 = vld [vmem:[#allocation4 + $0x20] sm:$0xf] }
  0x26   :  { %v1162_v13 = vor.u32 %v1381_v11, %v1159_v12  ;;  %v1364_v15 = vld [vmem:[#allocation4 + $0x24] sm:$0xf0]  ;;  %v1149_v16 = vld [vmem:[#allocation4 + $0xa0] sm:$0xf]  ;;  %v1363_v19 = vld [vmem:[#allocation4 + $0x24] sm:$0xf] }
  0x27   :  { %427 = vmatpush.bf16.msrb.mxu0 %v1114_v51  ;;  %v1086_v17 = vor.u32 %v1364_v15, %v1085_v14  ;;  %v1380_v18 = vld [vmem:[#allocation4 + $0xa4] sm:$0xf0]  ;;  %v1087_v20 = vld [vmem:[#allocation4 + $0x28] sm:$0xf0]  ;;  %v1379_v23 = vld [vmem:[#allocation4 + $0xa4] sm:$0xf] }
  0x28   :  { %446 = vmatpush.bf16.msrb.mxu1 %v1178_v52  ;;  %390 = vmatpush.bf16.msra.mxu2 %v1102_v59  ;;  %v1150_v21 = vor.u32 %v1380_v18, %v1149_v16  ;;  %v1090_v22 = vor.u32 %v1363_v19, %v1087_v20  ;;  %v1151_v24 = vld [vmem:[#allocation4 + $0xa8] sm:$0xf0]  ;;  %v1077_v26 = vld [vmem:[#allocation4 + $0x10] sm:$0xf]  ;;  %v1362_v27 = vld [vmem:[#allocation4 + $0x14] sm:$0xf0] }
  0x29   :  { %409 = vmatpush.bf16.msra.mxu3 %v1166_v60  ;;  %v1154_v25 = vor.u32 %v1379_v23, %v1151_v24  ;;  %v1141_v28 = vld [vmem:[#allocation4 + $0x90] sm:$0xf]  ;;  %v1078_v29 = vor.u32 %v1362_v27, %v1077_v26  ;;  %v1378_v30 = vld [vmem:[#allocation4 + $0x94] sm:$0xf0]  ;;  %v1361_v31 = vld [vmem:[#allocation4 + $0x14] sm:$0xf] }
  0x2a   :  { %v1079_v32 = vld [vmem:[#allocation4 + $0x18] sm:$0xf0]  ;;  %v1142_v33 = vor.u32 %v1378_v30, %v1141_v28  ;;  %v1377_v35 = vld [vmem:[#allocation4 + $0x94] sm:$0xf]  ;;  %v1069_v38 = vld [vmem:[#allocation4] sm:$0xf] }
  0x2b   :  { %428 = vmatpush.bf16.msrb.mxu0 %v1106_v61  ;;  %v1082_v34 = vor.u32 %v1361_v31, %v1079_v32  ;;  %v1143_v36 = vld [vmem:[#allocation4 + $0x98] sm:$0xf0]  ;;  %v1360_v39 = vld [vmem:[#allocation4 + $0x4] sm:$0xf0]  ;;  %v1133_v40 = vld [vmem:[#allocation4 + $0x80] sm:$0xf] }
  0x2c   :  { %447 = vmatpush.bf16.msrb.mxu1 %v1170_v62  ;;  %391 = vmatpush.bf16.msra.mxu2 %v1094_v5  ;;  %v1146_v37 = vor.u32 %v1377_v35, %v1143_v36  ;;  %v1070_v41 = vor.u32 %v1360_v39, %v1069_v38  ;;  %v1376_v42 = vld [vmem:[#allocation4 + $0x84] sm:$0xf0]  ;;  %v1359_v43 = vld [vmem:[#allocation4 + $0x4] sm:$0xf]  ;;  %v1071_v44 = vld [vmem:[#allocation4 + $0x8] sm:$0xf0] }
  0x2d   :  { %410 = vmatpush.bf16.msra.mxu3 %v1158_v9  ;;  %v1134_v45 = vor.u32 %v1376_v42, %v1133_v40  ;;  %v1074_v46 = vor.u32 %v1359_v43, %v1071_v44  ;;  %v1375_v47 = vld [vmem:[#allocation4 + $0x84] sm:$0xf]  ;;  %v1135_v48 = vld [vmem:[#allocation4 + $0x88] sm:$0xf0]  ;;  %v112_v50 = vld [vmem:[%s1777_s2] sm:$0x3] }
  0x2e   :  { %1064 = vmatmul.msk.bf16.gmra.mxu0 %vm138_vm0, %v107_v1  ;;  %v1138_v49 = vor.u32 %v1375_v47, %v1135_v48  ;;  %v114_v53 = vperm.slane %v112_v50, 0  ;;  %v115_v54 = vperm.slane %v112_v50, 1  ;;  %vm1036_vm4 = vcmask 1043456  }
  0x2f   :  { %1066 = vmatmul.msk.bf16.gmra.mxu1 %vm138_vm0, %v107_v1  ;;  %429 = vmatpush.bf16.msrb.mxu0 %v1098_v10 }
  0x30   :  { %448 = vmatpush.bf16.msrb.mxu1 %v1162_v13  ;;  %392 = vmatpush.bf16.msra.mxu2 %v1086_v17 }
  0x31   :  { %411 = vmatpush.bf16.msra.mxu3 %v1150_v21 }
  0x33   :  { %430 = vmatpush.bf16.msrb.mxu0 %v1090_v22 }
  0x34   :  { %449 = vmatpush.bf16.msrb.mxu1 %v1154_v25  ;;  %393 = vmatpush.bf16.msra.mxu2 %v1078_v29  ;;  %v471_v25 = vld [vmem:[%s1779_s4] sm:$0x3] }
  0x35   :  { %412 = vmatpush.bf16.msra.mxu3 %v1142_v33  ;;  %v473_v27 = vperm.slane %v471_v25, 0  ;;  %v474_v28 = vperm.slane %v471_v25, 1  ;;  %v1406_v25 = vld [vmem:[#allocation6 + $0x78] sm:$0xff] }
  0x37   :  { %431 = vmatpush.bf16.msrb.mxu0 %v1082_v34 }
  0x38   :  { %450 = vmatpush.bf16.msrb.mxu1 %v1146_v37  ;;  %394 = vmatpush.bf16.msra.mxu2 %v1070_v41 }
  0x39   :  { %413 = vmatpush.bf16.msra.mxu3 %v1134_v45 }
  0x3b   :  { %432 = vmatpush.bf16.msrb.mxu0 %v1074_v46 }
  0x3c   :  { %451 = vmatpush.bf16.msrb.mxu1 %v1138_v49 }
  0x3d   :  { %807 = vmatpush.bf16.msrb.mxu3 %v1406_v25 }
  0x9b   :  { %v154_v51 = vpop.f32.mrf.mxu0 }
  0x9c   :  { %v173_v52 = vpop.f32.mrf.mxu1  ;;  %v1674_v55 = vadd.f32 %v154_v51, %v114_v53 }
  0x9d   :  { %v1676_v56 = vadd.f32 %v173_v52, %v115_v54 }
  0x9e   :  { %v183_v61 = vmax.f32 %v1674_v55, 0.0 }
  0x9f   :  { %v184_v63 = vmax.f32 %v1676_v56, 0.0 }
  0xa3   :  { %v156_v57 = vpop.f32.mrf.mxu0 }
  0xa4   :  { %v1678_v58 = vadd.f32 %v156_v57, %v114_v53  ;;  %v175_v59 = vpop.f32.mrf.mxu1 }
  0xa5   :  { %v1680_v60 = vadd.f32 %v175_v59, %v115_v54 }
  0xa6   :  { %v185_v62 = vmax.f32 %v1678_v58, 0.0 }
  0xa7   :  { %v186_v0 = vmax.f32 %v1680_v60, 0.0 }
  0xa8   :  { %v191_v1 = vpack.c.bf16 %v185_v62, %v183_v61 }
  0xa9   :  { %v192_v2 = vpack.c.bf16 %v186_v0, %v184_v63 }
  0xaa   :  { %395 = vmatmul.bf16.vlgmr.msra.gmra.mxu2 %v191_v1  ;;  %433 = vmatmul.bf16.vlgmr.msrb.gmra.mxu0 %v191_v1 }
  0xab   :  { %414 = vmatmul.bf16.vlgmr.msra.gmra.mxu3 %v192_v2  ;;  %452 = vmatmul.bf16.vlgmr.msrb.gmra.mxu1 %v192_v2  ;;  %v159_v3 = vpop.f32.mrf.mxu0 }
  0xac   :  { %v178_v4 = vpop.f32.mrf.mxu1  ;;  %v1694_v5 = vadd.f32 %v159_v3, %v114_v53 }
  0xad   :  { %v1696_v6 = vadd.f32 %v178_v4, %v115_v54 }
  0xae   :  { %v187_v11 = vmax.f32 %v1694_v5, 0.0  ;;  %v1319_v5 = vld [vmem:[#allocation7 + $0x78] sm:$0xf0] }
  0xaf   :  { %v188_v13 = vmax.f32 %v1696_v6, 0.0 }
  0xb3   :  { %v161_v7 = vpop.f32.mrf.mxu0 }
  0xb4   :  { %v1698_v8 = vadd.f32 %v161_v7, %v114_v53  ;;  %v180_v9 = vpop.f32.mrf.mxu1 }
  0xb5   :  { %v1700_v10 = vadd.f32 %v180_v9, %v115_v54 }
  0xb6   :  { %v189_v12 = vmax.f32 %v1698_v8, 0.0 }
  0xb7   :  { %v190_v14 = vmax.f32 %v1700_v10, 0.0 }
  0xb8   :  { %v193_v15 = vpack.c.bf16 %v189_v12, %v187_v11 }
  0xb9   :  { %v194_v16 = vpack.c.bf16 %v190_v14, %v188_v13 }
  0xba   :  { %400 = vmatmul.bf16.gmra.mxu2 %v193_v15  ;;  %438 = vmatmul.bf16.gmra.mxu0 %v193_v15 }
  0xbb   :  { %419 = vmatmul.bf16.gmra.mxu3 %v194_v16  ;;  %457 = vmatmul.bf16.gmra.mxu1 %v194_v16 }
 0x127   :  { %v434_v17 = vpop.f32.mrf.mxu0 }
 0x128   :  { %v453_v18 = vpop.f32.mrf.mxu1 }
 0x129   :  { %v454_v19 = vadd.f32 %v453_v18, %v434_v17 }
 0x12b   :  { %1441 = vtanh.f32 %v454_v19 }
 0x12d   :  { %v396_v20 = vpop.f32.mrf.mxu2 }
 0x12e   :  { %v415_v21 = vpop.f32.mrf.mxu3 }
 0x12f   :  { %v416_v22 = vadd.f32 %v415_v21, %v396_v20  ;;  %v436_v23 = vpop.f32.mrf.mxu0 }
 0x130   :  { %v455_v24 = vpop.f32.mrf.mxu1 }
 0x131   :  { %1443 = vtanh.f32 %v416_v22  ;;  %v456_v26 = vadd.f32 %v455_v24, %v436_v23  ;;  %v1442_v29 = vpop.eup %1441  ;;  %v1398_v24 = vld [vmem:[#allocation6 + $0x38] sm:$0xff] }
 0x132   :  { %v478_v37 = vmul.f32 %v1442_v29, %v474_v28  ;;  %794 = vmatpush.bf16.msrb.mxu2 %v1398_v24 }
 0x133   :  { %1445 = vtanh.f32 %v456_v26 }
 0x135   :  { %v398_v30 = vpop.f32.mrf.mxu2 }
 0x136   :  { %v417_v31 = vpop.f32.mrf.mxu3 }
 0x137   :  { %v1444_v32 = vpop.eup %1443  ;;  %v418_v33 = vadd.f32 %v417_v31, %v398_v30  ;;  %v439_v34 = vpop.f32.mrf.mxu0  ;;  %v1397_v30 = vld [vmem:[#allocation6 + $0x30] sm:$0xff] }
 0x138   :  { %v458_v35 = vpop.f32.mrf.mxu1  ;;  %v477_v36 = vmul.f32 %v1444_v32, %v473_v27  ;;  %v1405_v31 = vld [vmem:[#allocation6 + $0x70] sm:$0xff]  ;;  %795 = vmatpush.bf16.msrb.mxu2 %v1397_v30 }
 0x139   :  { %1447 = vtanh.f32 %v418_v33  ;;  %v459_v39 = vadd.f32 %v458_v35, %v439_v34  ;;  %v1446_v40 = vpop.eup %1445  ;;  %808 = vmatpush.bf16.msrb.mxu3 %v1405_v31  ;;  %v1396_v34 = vld [vmem:[#allocation6 + $0x28] sm:$0xff] }
 0x13a   :  { %v485_v38 = vadd.f32 %v478_v37, %v477_v36  ;;  %v480_v48 = vmul.f32 %v1446_v40, %v474_v28  ;;  %v1404_v35 = vld [vmem:[#allocation6 + $0x68] sm:$0xff] }
 0x13b   :  { %1449 = vtanh.f32 %v459_v39 }
 0x13c   :  { %486 = vadd.xlane.f32.xlu0 %v485_v38  ;;  %796 = vmatpush.bf16.msrb.mxu2 %v1396_v34 }
 0x13d   :  { %v401_v41 = vpop.f32.mrf.mxu2  ;;  %809 = vmatpush.bf16.msrb.mxu3 %v1404_v35 }
 0x13e   :  { %v420_v42 = vpop.f32.mrf.mxu3 }
 0x13f   :  { %v1448_v43 = vpop.eup %1447  ;;  %v421_v44 = vadd.f32 %v420_v42, %v401_v41  ;;  %v441_v45 = vpop.f32.mrf.mxu0  ;;  %v1395_v41 = vld [vmem:[#allocation6 + $0x20] sm:$0xff] }
 0x140   :  { %v460_v46 = vpop.f32.mrf.mxu1  ;;  %v479_v47 = vmul.f32 %v1448_v43, %v473_v27  ;;  %v1403_v42 = vld [vmem:[#allocation6 + $0x60] sm:$0xff]  ;;  %797 = vmatpush.bf16.msrb.mxu2 %v1395_v41 }
 0x141   :  { %1451 = vtanh.f32 %v421_v44  ;;  %v461_v50 = vadd.f32 %v460_v46, %v441_v45  ;;  %v1450_v51 = vpop.eup %1449  ;;  %810 = vmatpush.bf16.msrb.mxu3 %v1403_v42 }
 0x142   :  { %v488_v49 = vadd.f32 %v480_v48, %v479_v47  ;;  %v482_v1 = vmul.f32 %v1450_v51, %v474_v28  ;;  %v1394_v48 = vld [vmem:[#allocation6 + $0x18] sm:$0xff] }
 0x143   :  { %1453 = vtanh.f32 %v461_v50 }
 0x144   :  { %489 = vadd.xlane.f32.xlu0 %v488_v49  ;;  %v1402_v49 = vld [vmem:[#allocation6 + $0x58] sm:$0xff]  ;;  %798 = vmatpush.bf16.msrb.mxu2 %v1394_v48 }
 0x145   :  { %v403_v52 = vpop.f32.mrf.mxu2  ;;  %811 = vmatpush.bf16.msrb.mxu3 %v1402_v49 }
 0x146   :  { %v422_v53 = vpop.f32.mrf.mxu3 }
 0x147   :  { %v1452_v54 = vpop.eup %1451  ;;  %v423_v57 = vadd.f32 %v422_v53, %v403_v52 }
 0x148   :  { %v481_v59 = vmul.f32 %v1452_v54, %v473_v27 }
 0x149   :  { %1455 = vtanh.f32 %v423_v57  ;;  %v1454_v3 = vpop.eup %1453 }
 0x14a   :  { %v491_v2 = vadd.f32 %v482_v1, %v481_v59  ;;  %v484_v9 = vmul.f32 %v1454_v3, %v474_v28  ;;  %v1393_v59 = vld [vmem:[#allocation6 + $0x10] sm:$0xff] }
 0x14b   :  { %v1401_v1 = vld [vmem:[#allocation6 + $0x50] sm:$0xff]  ;;  %799 = vmatpush.bf16.msrb.mxu2 %v1393_v59 }
 0x14c   :  { %492 = vadd.xlane.f32.xlu1 %v491_v2  ;;  %812 = vmatpush.bf16.msrb.mxu3 %v1401_v1 }
 0x14f   :  { %v1456_v4 = vpop.eup %1455 }
 0x150   :  { %v483_v7 = vmul.f32 %v1456_v4, %v473_v27 }
 0x152   :  { %v494_v15 = vadd.f32 %v484_v9, %v483_v7 }
 0x154   :  { %495 = vadd.xlane.f32.xlu1 %v494_v15 }
 0x1af   :  { %v487_v16 = vpop.xlane.xlu0 %486 }
 0x1b0   :  { %v497_v17 = vrot.slane %v487_v16, 4 }
 0x1b2   :  { %v498_v18 = vmax.f32 %v487_v16, %v497_v17  ;;  %v1392_v17 = vld [vmem:[#allocation6 + $0x8] sm:$0xff] }
 0x1b3   :  { %800 = vmatpush.bf16.msrb.mxu2 %v1392_v17  ;;  %v1420_v17 = vld [vmem:[#allocation7 + $0x64] sm:$0xf0] }
 0x1b4   :  { %v499_v19 = vrot.slane %v498_v18, 2 }
 0x1b6   :  { %v500_v20 = vmax.f32 %v498_v18, %v499_v19  ;;  %v1400_v18 = vld [vmem:[#allocation6 + $0x48] sm:$0xff] }
 0x1b7   :  { %v490_v21 = vpop.xlane.xlu0 %489  ;;  %813 = vmatpush.bf16.msrb.mxu3 %v1400_v18 }
 0x1b8   :  { %v501_v22 = vrot.slane %v500_v20, 1  ;;  %v503_v23 = vrot.slane %v490_v21, 4 }
 0x1ba   :  { %v502_v26 = vmax.f32 %v500_v20, %v501_v22  ;;  %v504_v29 = vmax.f32 %v490_v21, %v503_v23 }
 0x1bc   :  { %v521_v27 = vsub.f32 %v487_v16, %v502_v26  ;;  %v505_v28 = vrot.slane %v504_v29, 2  ;;  %v1391_v26 = vld [vmem:[#allocation6] sm:$0xff] }
 0x1bd   :  { %801 = vmatpush.bf16.msrb.mxu2 %v1391_v26 }
 0x1be   :  { %v525_v32 = vmul.f32 1.442695, %v521_v27  ;;  %v506_v33 = vmax.f32 %v504_v29, %v505_v28  ;;  %v1399_v29 = vld [vmem:[#allocation6 + $0x40] sm:$0xff] }
 0x1bf   :  { %v493_v36 = vpop.xlane.xlu1 %492  ;;  %814 = vmatpush.bf16.msrb.mxu3 %v1399_v29 }
 0x1c0   :  { %1457 = vpow2.f32 %v525_v32  ;;  %v507_v37 = vrot.slane %v506_v33, 1  ;;  %v509_v38 = vrot.slane %v493_v36, 4 }
 0x1c2   :  { %v508_v39 = vmax.f32 %v506_v33, %v507_v37  ;;  %v510_v40 = vmax.f32 %v493_v36, %v509_v38 }
 0x1c4   :  { %v522_v43 = vsub.f32 %v490_v21, %v508_v39  ;;  %v511_v44 = vrot.slane %v510_v40, 2 }
 0x1c6   :  { %v1458_v45 = vpop.eup %1457  ;;  %v527_v46 = vmul.f32 1.442695, %v522_v43  ;;  %v512_v47 = vmax.f32 %v510_v40, %v511_v44 }
 0x1c7   :  { %v496_v50 = vpop.xlane.xlu1 %495  ;;  %v533_v53 = vrot.slane %v1458_v45, 4  ;;  %v561_v2 = vmul.f32 %v1458_v45, %v183_v61  ;;  %v562_v22 = vmul.f32 %v1458_v45, %v184_v63 }
 0x1c8   :  { %1459 = vpow2.f32 %v527_v46  ;;  %v513_v51 = vrot.slane %v512_v47, 1  ;;  %v515_v52 = vrot.slane %v496_v50, 4 }
 0x1c9   :  { %v534_v7 = vadd.f32 %v1458_v45, %v533_v53  ;;  %v569_v19 = vrot.slane %v561_v2, 4  ;;  %v1317_v53 = vld [vmem:[#allocation7 + $0x70] sm:$0xf] }
 0x1ca   :  { %v514_v54 = vmax.f32 %v512_v47, %v513_v51  ;;  %v516_v57 = vmax.f32 %v496_v50, %v515_v52 }
 0x1cb   :  { %v535_v61 = vrot.slane %v534_v7, 2  ;;  %v570_v30 = vadd.f32 %v569_v19, %v561_v2  ;;  %v1311_v2 = vld [vmem:[#allocation7 + $0x68] sm:$0xf0] }
 0x1cc   :  { %v523_v3 = vsub.f32 %v493_v36, %v514_v54  ;;  %v517_v4 = vrot.slane %v516_v57, 2  ;;  %v1422_v54 = vld [vmem:[#allocation7 + $0x74] sm:$0xf0] }
 0x1cd   :  { %v536_v56 = vadd.f32 %v535_v61, %v534_v7  ;;  %v571_v60 = vrot.slane %v570_v30, 2  ;;  %v1318_v1 = vor.u32 %v1422_v54, %v1317_v53 }
 0x1ce   :  { %v1460_v9 = vpop.eup %1459  ;;  %v529_v15 = vmul.f32 1.442695, %v523_v3  ;;  %v518_v16 = vmax.f32 %v516_v57, %v517_v4  ;;  %v1419_v57 = vld [vmem:[#allocation7 + $0x64] sm:$0xf]  ;;  %v1309_v3 = vld [vmem:[#allocation7 + $0x60] sm:$0xf] }
 0x1cf   :  { %v539_v20 = vrot.slane %v1460_v9, 4  ;;  %v563_v21 = vmul.f32 %v1460_v9, %v185_v62  ;;  %v564_v23 = vmul.f32 %v1460_v9, %v186_v0  ;;  %v575_v62 = vrot.slane %v562_v22, 4  ;;  %924 = vmatpush.bf16.msra.mxu0 %v1318_v1 }
 0x1d0   :  { %1461 = vpow2.f32 %v529_v15  ;;  %v519_v55 = vrot.slane %v518_v16, 1  ;;  %v537_v38 = vrot.slane %v536_v56, 1  ;;  %v1729_v43 = vadd.f32 %v571_v60, %v570_v30  ;;  %v1293_v60 = vld [vmem:[#allocation7 + $0x40] sm:$0xf] }
 0x1d1   :  { %v540_v24 = vadd.f32 %v1460_v9, %v539_v20  ;;  %v581_v31 = vrot.slane %v563_v21, 4  ;;  %v587_v27 = vrot.slane %v564_v23, 4  ;;  %v576_v37 = vadd.f32 %v575_v62, %v562_v22 }
 0x1d2   :  { %v520_v25 = vmax.f32 %v518_v16, %v519_v55  ;;  %v573_v7 = vrot.slane %v1729_v43, 1  ;;  %v1310_v61 = vor.u32 %v1420_v17, %v1309_v3 }
 0x1d3   :  { %v541_v58 = vrot.slane %v540_v24, 2  ;;  %v582_v0 = vadd.f32 %v581_v31, %v563_v21  ;;  %v588_v34 = vadd.f32 %v587_v27, %v564_v23  ;;  %v577_v49 = vrot.slane %v576_v37, 2  ;;  %v1417_v23 = vld [vmem:[#allocation7 + $0x54] sm:$0xf] }
 0x1d4   :  { %v524_v28 = vsub.f32 %v496_v50, %v520_v25  ;;  %v1421_v50 = vld [vmem:[#allocation7 + $0x74] sm:$0xf]  ;;  %v1314_v21 = vor.u32 %v1419_v57, %v1311_v2  ;;  %925 = vmatpush.bf16.msra.mxu0 %v1310_v61  ;;  %v574_v54 = vadd.f32 %v573_v7, %v1729_v43  ;;  %v1412_v43 = vld [vmem:[#allocation7 + $0x24] sm:$0xf0] }
 0x1d5   :  { %v542_v63 = vadd.f32 %v541_v58, %v540_v24  ;;  %v583_v44 = vrot.slane %v582_v0, 2  ;;  %v589_v45 = vrot.slane %v588_v34, 2  ;;  %v1322_v59 = vor.u32 %v1421_v50, %v1319_v5  ;;  %v1303_v24 = vld [vmem:[#allocation7 + $0x58] sm:$0xf0]  ;;  %v1418_v58 = vld [vmem:[#allocation7 + $0x54] sm:$0xf0] }
 0x1d6   :  { %v1462_v32 = vpop.eup %1461  ;;  %v531_v33 = vmul.f32 1.442695, %v524_v28  ;;  %v578_v27 = vadd.f32 %v577_v49, %v576_v37  ;;  %v1306_v10 = vor.u32 %v1417_v23, %v1303_v24 }
 0x1d7   :  { %v545_v35 = vrot.slane %v1462_v32, 4  ;;  %v565_v36 = vmul.f32 %v1462_v32, %v187_v11  ;;  %v543_v39 = vrot.slane %v542_v63, 1  ;;  %v566_v40 = vmul.f32 %v1462_v32, %v188_v13  ;;  %937 = vmatpush.bf16.msra.mxu1 %v1322_v59 }
 0x1d8   :  { %1463 = vpow2.f32 %v531_v33  ;;  %v538_v11 = vadd.f32 %v537_v38, %v536_v56  ;;  %v584_v9 = vadd.f32 %v583_v44, %v582_v0  ;;  %v590_v15 = vadd.f32 %v589_v45, %v588_v34  ;;  %v1295_v56 = vld [vmem:[#allocation7 + $0x48] sm:$0xf0]  ;;  %v1416_v0 = vld [vmem:[#allocation7 + $0x44] sm:$0xf0]  ;;  %v1413_v45 = vld [vmem:[#allocation7 + $0x34] sm:$0xf] }
 0x1d9   :  { %v546_v41 = vadd.f32 %v1462_v32, %v545_v35  ;;  %v593_v42 = vrot.slane %v565_v36, 4  ;;  %v599_v46 = vrot.slane %v566_v40, 4  ;;  %v544_v51 = vadd.f32 %v543_v39, %v542_v63 }
 0x1da   :  { %v585_v31 = vrot.slane %v584_v9, 1  ;;  %v591_v32 = vrot.slane %v590_v15, 1  ;;  %v579_v39 = vrot.slane %v578_v27, 1  ;;  %v1294_v44 = vor.u32 %v1416_v0, %v1293_v60 }
 0x1db   :  { %v547_v47 = vrot.slane %v546_v41, 2  ;;  %v594_v48 = vadd.f32 %v593_v42, %v565_v36  ;;  %v600_v52 = vadd.f32 %v599_v46, %v566_v40  ;;  %1465 = vrcp.f32 %v544_v51  ;;  %938 = vmatpush.bf16.msra.mxu1 %v1314_v21  ;;  %v1287_v46 = vld [vmem:[#allocation7 + $0x38] sm:$0xf0]  ;;  %v1414_v51 = vld [vmem:[#allocation7 + $0x34] sm:$0xf0] }
 0x1dc   :  { %1467 = vrcp.f32 %v538_v11  ;;  %v592_v50 = vadd.f32 %v591_v32, %v590_v15  ;;  %v1285_v11 = vld [vmem:[#allocation7 + $0x30] sm:$0xf]  ;;  %v580_v59 = vadd.f32 %v579_v39, %v578_v27  ;;  %v1290_v2 = vor.u32 %v1413_v45, %v1287_v46  ;;  %v1411_v15 = vld [vmem:[#allocation7 + $0x24] sm:$0xf]  ;;  %v1277_v21 = vld [vmem:[#allocation7 + $0x20] sm:$0xf] }
 0x1dd   :  { %v548_v6 = vadd.f32 %v547_v47, %v546_v41  ;;  %v595_v13 = vrot.slane %v594_v48, 2  ;;  %v601_v16 = vrot.slane %v600_v52, 2  ;;  %v1278_v24 = vor.u32 %v1412_v43, %v1277_v21  ;;  %v1410_v45 = vld [vmem:[#allocation7 + $0x14] sm:$0xf0] }
 0x1de   :  { %v1464_v4 = vpop.eup %1463 }
 0x1df   :  { %v549_v18 = vrot.slane %v548_v6, 1  ;;  %v551_v19 = vrot.slane %v1464_v4, 4  ;;  %v567_v20 = vmul.f32 %v1464_v4, %v189_v12  ;;  %v596_v22 = vadd.f32 %v595_v13, %v594_v48  ;;  %v1301_v12 = vld [vmem:[#allocation7 + $0x50] sm:$0xf]  ;;  %939 = vmatpush.bf16.msra.mxu1 %v1306_v10 }
 0x1e0   :  { %v568_v55 = vmul.f32 %v1464_v4, %v190_v14  ;;  %v602_v30 = vadd.f32 %v601_v16, %v600_v52  ;;  %v1415_v14 = vld [vmem:[#allocation7 + $0x44] sm:$0xf]  ;;  %v1302_v37 = vor.u32 %v1418_v58, %v1301_v12  ;;  %v586_v48 = vadd.f32 %v585_v31, %v584_v9  ;;  %v1279_v16 = vld [vmem:[#allocation7 + $0x28] sm:$0xf0] }
 0x1e1   :  { %v550_v25 = vadd.f32 %v549_v18, %v548_v6  ;;  %v552_v26 = vadd.f32 %v1464_v4, %v551_v19  ;;  %v605_v29 = vrot.slane %v567_v20, 4  ;;  %v597_v63 = vrot.slane %v596_v22, 1  ;;  %v1466_v38 = vpop.eup %1465 }
 0x1e2   :  { %v611_v8 = vrot.slane %v568_v55, 4  ;;  %v603_v36 = vrot.slane %v602_v30, 1  ;;  %926 = vmatpush.bf16.msra.mxu0 %v1302_v37  ;;  %v1298_v42 = vor.u32 %v1415_v14, %v1295_v56  ;;  %v1468_v47 = vpop.eup %1467  ;;  %v619_v13 = vmul.f32 %v1466_v38, %v586_v48  ;;  %v1263_v48 = vld [vmem:[#allocation7 + $0x8] sm:$0xf0] }
 0x1e3   :  { %v553_v62 = vrot.slane %v552_v26, 2  ;;  %1469 = vrcp.f32 %v550_v25  ;;  %v606_v28 = vadd.f32 %v605_v29, %v567_v20  ;;  %v598_v57 = vadd.f32 %v597_v63, %v596_v22 }
 0x1e4   :  { %v612_v33 = vadd.f32 %v611_v8, %v568_v55  ;;  %v604_v6 = vadd.f32 %v603_v36, %v602_v30  ;;  %v620_v1 = vmul.f32 %v1466_v38, %v592_v50  ;;  %940 = vmatpush.bf16.msra.mxu1 %v1298_v42  ;;  %v1286_v9 = vor.u32 %v1414_v51, %v1285_v11  ;;  %v1269_v42 = vld [vmem:[#allocation7 + $0x10] sm:$0xf]  ;;  %v1430_v51 = vld [vmem:[%s1784_s9 + $0x38] sm:$0xff] }
 0x1e5   :  { %v554_v34 = vadd.f32 %v553_v62, %v552_v26  ;;  %v607_v35 = vrot.slane %v606_v28, 2  ;;  %v617_v18 = vmul.f32 %v1468_v47, %v574_v54  ;;  %v618_v20 = vmul.f32 %v1468_v47, %v580_v59  ;;  %v1407_v47 = vld [vmem:[#allocation7 + $0x4] sm:$0xf]  ;;  %1020 = vmatpush.bf16.msra.mxu2 %v1430_v51 }
 0x1e6   :  { %v613_v40 = vrot.slane %v612_v33, 2  ;;  %927 = vmatpush.bf16.msra.mxu0 %v1294_v44  ;;  %v627_v7 = vpack.c.bf16 %v619_v13, %v619_v13  ;;  %v628_v22 = vpack.c.bf16 %v620_v1, %v620_v1  ;;  %v1282_v55 = vor.u32 %v1411_v15, %v1279_v16  ;;  %v1427_v54 = vld [vmem:[%s1784_s9 + $0x20] sm:$0xff] }
 0x1e7   :  { %v555_v41 = vrot.slane %v554_v34, 1  ;;  %v608_v49 = vadd.f32 %v607_v35, %v606_v28  ;;  %v625_v26 = vpack.c.bf16 %v617_v18, %v617_v18  ;;  %v626_v30 = vpack.c.bf16 %v618_v20, %v618_v20  ;;  %v1439_v13 = vld [vmem:[%s1781_s6] ss:$0 sm:$0xff] }
 0x1e8   :  { %v614_v5 = vadd.f32 %v613_v40, %v612_v33  ;;  %941 = vmatpush.bf16.msra.mxu1 %v1290_v2  ;;  %v679_v8 = vunpack.c.l.b16 %v627_v7  ;;  %v680_v58 = vunpack.c.l.b16 %v628_v22  ;;  %v1409_v40 = vld [vmem:[#allocation7 + $0x14] sm:$0xf]  ;;  %v1270_v46 = vor.u32 %v1410_v45, %v1269_v42  ;;  %v1423_v18 = vld [vmem:[%s1784_s9] sm:$0xff] }
 0x1e9   :  { %v1470_v52 = vpop.eup %1469  ;;  %v556_v53 = vadd.f32 %v555_v41, %v554_v34  ;;  %v609_v17 = vrot.slane %v608_v49, 1  ;;  %v677_v14 = vunpack.c.l.b16 %v625_v26  ;;  %v678_v63 = vunpack.c.l.b16 %v626_v30  ;;  %v1271_v41 = vld [vmem:[#allocation7 + $0x18] sm:$0xf0] }
 0x1ea   :  { %v621_v3 = vmul.f32 %v1470_v52, %v598_v57  ;;  %v622_v4 = vmul.f32 %v1470_v52, %v604_v6  ;;  %v615_v19 = vrot.slane %v614_v5, 1  ;;  %928 = vmatpush.bf16.msra.mxu0 %v1286_v9  ;;  %v1274_v44 = vor.u32 %v1409_v40, %v1271_v41  ;;  %v1429_v52 = vld [vmem:[%s1784_s9 + $0x30] sm:$0xff]  ;;  %v1426_v57 = vld [vmem:[%s1784_s9 + $0x18] sm:$0xff] }
 0x1eb   :  { %1471 = vrcp.f32 %v556_v53  ;;  %v610_v25 = vadd.f32 %v609_v17, %v608_v49  ;;  %v686_v33 = vsel %vm685_vm1, %v679_v8, %v677_v14  ;;  %v691_v0 = vsel %vm685_vm1, %v680_v58, %v678_v63  ;;  %v1261_v49 = vld [vmem:[#allocation7] sm:$0xf]  ;;  %1021 = vmatpush.bf16.msra.mxu2 %v1429_v52  ;;  %v1428_v53 = vld [vmem:[%s1784_s9 + $0x28] sm:$0xff]  ;;  %v1425_v6 = vld [vmem:[%s1784_s9 + $0x10] sm:$0xff] }
 0x1ec   :  { %v629_v61 = vpack.c.bf16 %v621_v3, %v621_v3  ;;  %v630_v23 = vpack.c.bf16 %v622_v4, %v622_v4  ;;  %v616_v29 = vadd.f32 %v615_v19, %v614_v5  ;;  %942 = vmatpush.bf16.msra.mxu1 %v1282_v55  ;;  %v1266_v50 = vor.u32 %v1407_v47, %v1263_v48  ;;  %v1408_v5 = vld [vmem:[#allocation7 + $0x4] sm:$0xf0]  ;;  %v838_v19 = vld [vmem:[%s1783_s8] sm:$0x3] }
 0x1ed   :  { %v1262_v11 = vor.u32 %v1408_v5, %v1261_v49  ;;  %v1424_v17 = vld [vmem:[%s1784_s9 + $0x8] sm:$0xff]  ;;  %v841_v20 = vperm.slane %v838_v19, 1 }
 0x1ee   :  { %v681_v62 = vunpack.c.l.b16 %v629_v61  ;;  %v682_v28 = vunpack.c.l.b16 %v630_v23  ;;  %929 = vmatpush.bf16.msra.mxu0 %v1278_v24  ;;  %v1440_v24 = vld [vmem:[%s1785_s10] ss:$0 sm:$0xff] }
 0x1ef   :  { %1022 = vmatpush.bf16.msra.mxu2 %v1428_v53 }
 0x1f0   :  { %v688_v34 = vsel %vm687_vm2, %v681_v62, %v686_v33  ;;  %v692_v35 = vsel %vm687_vm2, %v682_v28, %v691_v0  ;;  %943 = vmatpush.bf16.msra.mxu1 %v1274_v44 }
 0x1f1   :  { %v1472_v31 = vpop.eup %1471 }
 0x1f2   :  { %v623_v27 = vmul.f32 %v1472_v31, %v610_v25  ;;  %v624_v12 = vmul.f32 %v1472_v31, %v616_v29  ;;  %930 = vmatpush.bf16.msra.mxu0 %v1270_v46  ;;  %v840_v25 = vperm.slane %v838_v19, 0 }
 0x1f3   :  { %1023 = vmatpush.bf16.msra.mxu2 %v1427_v54 }
 0x1f4   :  { %v631_v10 = vpack.c.bf16 %v623_v27, %v623_v27  ;;  %v632_v56 = vpack.c.bf16 %v624_v12, %v624_v12  ;;  %944 = vmatpush.bf16.msra.mxu1 %v1266_v50 }
 0x1f6   :  { %v683_v32 = vunpack.c.l.b16 %v631_v10  ;;  %v684_v60 = vunpack.c.l.b16 %v632_v56  ;;  %931 = vmatpush.bf16.msra.mxu0 %v1262_v11 }
 0x1f7   :  { %1024 = vmatpush.bf16.msra.mxu2 %v1426_v57 }
 0x1f8   :  { %v690_v36 = vsel %vm689_vm3, %v683_v32, %v688_v34  ;;  %v693_v37 = vsel %vm689_vm3, %v684_v60, %v692_v35 }
 0x1f9   :  { %v694_v38 = vpack.c.b16 %v690_v36, %v690_v36  ;;  %v695_v39 = vpack.c.b16 %v693_v37, %v693_v37 }
 0x1fb   :  { %802 = vmatmul.bf16.vlgmr.msrb.gmra.mxu2 %v694_v38  ;;  %815 = vmatmul.bf16.vlgmr.msrb.gmra.mxu3 %v695_v39 }
 0x1fc   :  { %1025 = vmatpush.bf16.msra.mxu2 %v1425_v6 }
 0x200   :  { %1026 = vmatpush.bf16.msra.mxu2 %v1424_v17 }
 0x204   :  { %1027 = vmatpush.bf16.msra.mxu2 %v1423_v18 }
 0x27e   :  { %v803_v59 = vpop.f32.mrf.mxu2  ;;  %v816_v1 = vpop.f32.mrf.mxu3 }
 0x27f   :  { %v804_v2 = vadd.f32 %v1439_v13, %v803_v59 }
 0x281   :  { %v817_v3 = vadd.f32 %v816_v1, %v804_v2 }
 0x283   :  { %v820_v4 = vmax.f32 %v817_v3, 0.0 }
 0x285   :  { %v821_v9 = vpack.c.bf16 %v820_v4, %v820_v4 }
 0x286   :  { %v805_v15 = vpop.f32.mrf.mxu2  ;;  %v818_v16 = vpop.f32.mrf.mxu3 }
 0x287   :  { %932 = vmatmul.bf16.vlgmr.msra.gmra.mxu0 %v821_v9  ;;  %945 = vmatmul.bf16.vlgmr.msra.gmra.mxu1 %v821_v9 }
 0x304   :  { %v933_v21 = vpop.f32.mrf.mxu0  ;;  %v946_v43 = vpop.f32.mrf.mxu1 }
 0x305   :  { %v947_v7 = vadd.f32 %v946_v43, %v841_v20  ;;  %v934_v30 = vadd.f32 %v933_v21, %v840_v25 }
 0x307   :  { %v950_v22 = vmax.f32 %v947_v7, 0.0 }
 0x309   :  { %v951_v55 = vpack.c.bf16 %v950_v22, %v950_v22 }
 0x30b   :  { %1028 = vmatmul.bf16.vlgmr.msra.gmra.mxu2 %v951_v55 }
 0x30c   :  { %v935_v61 = vpop.f32.mrf.mxu0  ;;  %v948_v23 = vpop.f32.mrf.mxu1 }
 0x38e   :  { %v1029_v26 = vpop.f32.mrf.mxu2 }
 0x38f   :  { %v1030_v29 = vadd.f32 %v1440_v24, %v1029_v26 }
 0x391   :  { %v1035_v31 = vrot.slane %v1030_v29, 4 }
 0x393   :  { %v1037_v27 = vsel %vm1036_vm4, %v934_v30, %v1035_v31 }
 0x394   :  { %1039 = vst [vmem:[%s1786_s11] sm:$0xff] %v1037_v27 }
 0x396   :  { %v1031_v8 = vpop.f32.mrf.mxu2 }
 0x397   :  { %1044 = vsyncpa [#allocation3], 1 }
 0x398   :  { %1045 = vsyncpa [#allocation5], 1 }
 0x399   :  { %1046 = vsyncpa [#allocation8], 1 }

</bundles_post_ra>
